<compile_context>
chip_gen: v6e
topology: v6e:2x2x1
jax: 0.10.0
libtpu: 0.0.40
codegen_flags: <defaults>
</compile_context>

<pallas_src>
import functools

import jax
import jax.numpy as jnp
from jax.experimental import pallas as pl
from jax.experimental.pallas import tpu as pltpu


# ---------------------------------------------------------------------------
# Kernels
# ---------------------------------------------------------------------------
def _kernel_acc_into_output(x_ref, w_ref, o_ref, *, mxu_dtype):
    """f32 output: accumulate directly into the resident output block."""
    k = pl.program_id(2)

    @pl.when(k == 0)
    def _init():
        o_ref[...] = jnp.zeros_like(o_ref)

    x = x_ref[...]
    w = w_ref[...]
    if mxu_dtype is not None:
        x = x.astype(mxu_dtype)
        w = w.astype(mxu_dtype)
    w = jnp.abs(w)  # |W| fused on-chip (VPU), fed straight to the MXU
    o_ref[...] += jnp.dot(x, w, preferred_element_type=jnp.float32)


def _kernel_acc_scratch(x_ref, w_ref, o_ref, acc_ref, *, mxu_dtype):
    """Non-f32 output: accumulate in an f32 VMEM scratch, cast at the end."""
    k = pl.program_id(2)

    @pl.when(k == 0)
    def _init():
        acc_ref[...] = jnp.zeros_like(acc_ref)

    x = x_ref[...]
    w = w_ref[...]
    if mxu_dtype is not None:
        x = x.astype(mxu_dtype)
        w = w.astype(mxu_dtype)
    w = jnp.abs(w)
    acc_ref[...] += jnp.dot(x, w, preferred_element_type=jnp.float32)

    @pl.when(k == pl.num_programs(2) - 1)
    def _finalize():
        o_ref[...] = acc_ref[...].astype(o_ref.dtype)


# ---------------------------------------------------------------------------
# Wrapper
# ---------------------------------------------------------------------------
_VMEM_BUDGET_BYTES = 36 * 1024 * 1024  # conservative cap, safe on v5e/v6e/v7x


def _pos_linear_2d(x, weight, *, tile_m, tile_n, tile_k, mxu_dtype):
    M, K = x.shape
    K2, N = weight.shape
    assert K == K2, f"in_dim mismatch: {K} vs {K2}"
    assert tile_m % 8 == 0 and tile_n % 128 == 0 and tile_k % 128 == 0

    # Unify dtypes (mixed-dtype MXU lowering is untested territory).
    dt = jnp.promote_types(x.dtype, weight.dtype)
    x = x.astype(dt)
    weight = weight.astype(dt)
    out_dtype = dt

    # ---- adaptive tile selection -------------------------------------------
    # M / N edges may be masked (garbage only reaches masked-out rows/cols).
    tm = M if M <= tile_m else tile_m
    tn = N if N <= tile_n else tile_n
    # K must be tiled exactly (padding garbage in K would corrupt every output).
    if K <= tile_k:
        tk = K
    else:
        tk = None
        for cand in sorted({tile_k, 512, 256, 128}, reverse=True):
            if cand % 128 == 0 and cand <= K and K % cand == 0:
                tk = cand
                break
        if tk is None:
            tk = K  # ragged large K: single full-K block (VMEM-checked below)

    in_itemsize = jnp.dtype(dt).itemsize
    out_itemsize = jnp.dtype(out_dtype).itemsize
    use_scratch = jnp.dtype(out_dtype) != jnp.dtype(jnp.float32)
    footprint = (
        2 * (tm * tk + tk * tn) * in_itemsize   # double-buffered x / w tiles
        + 2 * tm * tn * out_itemsize            # double-buffered output tile
        + (tm * tn * 4 if use_scratch else 0)   # f32 accumulator
    )
    if footprint > _VMEM_BUDGET_BYTES:
        # Shapes whose minimal legal tiling blows the VMEM budget: fused XLA
        # abs+dot, with HIGHEST precision for parity with the f32 reference.
        return jnp.dot(x, jnp.abs(weight), precision=jax.lax.Precision.HIGHEST)

    grid = (pl.cdiv(M, tm), pl.cdiv(N, tn), K // tk)

    vmem_limit = None
    need = footprint + (1 << 20)  # headroom for compiler temporaries
    if need > (16 << 20):
        vmem_limit = int(min(need * 5 // 4, 48 << 20))

    cost = pl.CostEstimate(
        flops=2 * M * N * K,
        transcendentals=0,
        bytes_accessed=int((M * K + K * N) * in_itemsize + M * N * out_itemsize),
    )

    if use_scratch:
        kernel = functools.partial(_kernel_acc_scratch, mxu_dtype=mxu_dtype)
        scratch_shapes = [pltpu.VMEM((tm, tn), jnp.float32)]
    else:
        kernel = functools.partial(_kernel_acc_into_output, mxu_dtype=mxu_dtype)
        scratch_shapes = []

    return pl.pallas_call(
        kernel,
        out_shape=jax.ShapeDtypeStruct((M, N), out_dtype),
        grid=grid,
        in_specs=[
            pl.BlockSpec((tm, tk), lambda i, j, k: (i, k)),
            pl.BlockSpec((tk, tn), lambda i, j, k: (k, j)),
        ],
        out_specs=pl.BlockSpec((tm, tn), lambda i, j, k: (i, j)),
        scratch_shapes=scratch_shapes,
        compiler_params=pltpu.CompilerParams(
            dimension_semantics=("parallel", "parallel", "arbitrary"),
            vmem_limit_bytes=vmem_limit,
        ),
        cost_estimate=cost,
    )(x, weight)


def pos_linear(x, weight, *, tile_m=512, tile_n=512, tile_k=512, mxu_dtype=None):
    """x: [..., K], weight: [K, N]  ->  x @ |weight| : [..., N]."""
    K, N = weight.shape
    lead = x.shape[:-1]
    assert x.shape[-1] == K, f"in_dim mismatch: {x.shape[-1]} vs {K}"
    x2 = x.reshape(-1, K)
    out2 = _pos_linear_2d(
        x2, weight, tile_m=tile_m, tile_n=tile_n, tile_k=tile_k, mxu_dtype=mxu_dtype
    )
    return out2.reshape(*lead, N)


class PosLinearJax:
    """Mirror of the PyTorch PosLinear module.

    __init__(in_dim, out_dim, weights): weights has shape (out_dim, in_dim);
    the stored parameter is its transpose (in_dim, out_dim), as in PyTorch.
    forward(x) = x @ |weight|.

    param_dtype: optionally store the weight in HBM at a narrower dtype
    (e.g. jnp.bfloat16) to halve streamed weight traffic on mem-bound shapes.
    mxu_dtype (via pallas_kwargs): opt-in bf16 MXU inputs, f32 accumulation.
    """

    def __init__(self, in_dim, out_dim, weights, *, param_dtype=None, **pallas_kwargs):
        assert weights.shape == (out_dim, in_dim)
        w = jnp.transpose(weights, (1, 0))  # (in_dim, out_dim)
        if param_dtype is not None:
            w = w.astype(param_dtype)
        self.weight = w
        self._pallas_kwargs = pallas_kwargs

    def __call__(self, x):
        return pos_linear(x, self.weight, **self._pallas_kwargs)


# ---------------------------------------------------------------------------
# Self-test
# ---------------------------------------------------------------------------
if __name__ == "__main__":
    key = jax.random.PRNGKey(0)
    k1, k2, k3, k4, k5, k6, k7 = jax.random.split(key, 7)

    def _ref(x, w_out_in):
        return jnp.matmul(
            x, jnp.abs(jnp.transpose(w_out_in, (1, 0))),
            precision=jax.lax.Precision.HIGHEST,
        )

    # (a) Small, module-consistent shapes (batch=8, in_dim=32, out_dim=16).
    #     Full-extent blocks, grid (1,1,1) -> still the fused Pallas path.
    in_dim, out_dim, batch = 32, 16, 8
    w_small = jax.random.normal(k1, (out_dim, in_dim), dtype=jnp.float32)
    x_small = jax.random.normal(k2, (batch, in_dim), dtype=jnp.float32)
    layer_small = PosLinearJax(in_dim, out_dim, w_small)
    out_small = jax.block_until_ready(layer_small(x_small))
    assert out_small.shape == (batch, out_dim)
    assert jnp.allclose(out_small, _ref(x_small, w_small), rtol=1e-2, atol=1e-2), \
        "mismatch vs reference (small shapes)"

    # (b) Tile-aligned shapes -> exercises K-accumulation across grid axis 2.
    M, K, N = 512, 1024, 256
    w_big = jax.random.normal(k3, (N, K), dtype=jnp.float32)   # (out_dim, in_dim)
    x_big = jax.random.normal(k4, (M, K), dtype=jnp.float32)
    layer_big = PosLinearJax(K, N, w_big)
    out_big = jax.block_until_ready(layer_big(x_big))
    assert out_big.shape == (M, N)
    assert jnp.allclose(out_big, _ref(x_big, w_big), rtol=1e-2, atol=1e-2), \
        "mismatch vs reference (tile-aligned shapes)"

    # (c) Ragged shapes -> exercises masked edge tiles on M and adaptive tk.
    M, K, N = 600, 640, 384
    w_rag = jax.random.normal(k5, (N, K), dtype=jnp.float32)
    x_rag = jax.random.normal(k6, (M, K), dtype=jnp.float32)
    layer_rag = PosLinearJax(K, N, w_rag)
    out_rag = jax.block_until_ready(layer_rag(x_rag))
    assert out_rag.shape == (M, N)
    assert jnp.allclose(out_rag, _ref(x_rag, w_rag), rtol=1e-2, atol=1e-2), \
        "mismatch vs reference (ragged shapes)"

    # (d) Batched (3-D) input, matching torch.matmul broadcasting.
    x_3d = jax.random.normal(k7, (2, 8, in_dim), dtype=jnp.float32)
    out_3d = jax.block_until_ready(layer_small(x_3d))
    assert out_3d.shape == (2, 8, out_dim)
    assert jnp.allclose(out_3d, _ref(x_3d, w_small), rtol=1e-2, atol=1e-2), \
        "mismatch vs reference (3-D input)"

    # TODO(synk): if a caller accepts bf16 numerics, pass param_dtype=jnp.bfloat16
    # and mxu_dtype=jnp.bfloat16 to halve HBM traffic and use the fast MXU path.
    print("KERNEL_OK")
</pallas_src>

<mosaic_0001>
module attributes {stable_mosaic.version = 11 : i64} {
  func.func @_kernel_acc_into_output(%arg0: i32, %arg1: i32, %arg2: i32, %arg3: memref<8x32xf32, #tpu.memory_space<vmem>>, %arg4: memref<32x16xf32, #tpu.memory_space<vmem>>, %arg5: memref<8x16xf32, #tpu.memory_space<vmem>>) attributes {dimension_semantics = [#tpu.dimension_semantics<parallel>, #tpu.dimension_semantics<parallel>, #tpu.dimension_semantics<arbitrary>], iteration_bounds = array<i64: 1, 1, 1>, scalar_prefetch = 0 : i64, scratch_operands = 0 : i64, tpu.core_type = #tpu.core_type<tc>, window_params = [{transform_indices = @transform_0, window_bounds = array<i64: 8, 32>}, {transform_indices = @transform_1, window_bounds = array<i64: 32, 16>}, {transform_indices = @transform_2, window_bounds = array<i64: 8, 16>}]} {
    %c0_i32 = arith.constant 0 : i32
    %0 = arith.cmpi eq, %arg2, %c0_i32 : i32
    %1 = arith.extui %0 : i1 to i32
    %c0_i32_0 = arith.constant 0 : i32
    %2 = arith.cmpi ne, %1, %c0_i32_0 : i32
    scf.if %2 {
      %cst_8 = arith.constant 0.000000e+00 : f32
      %10 = vector.broadcast %cst_8 : f32 to vector<8x16xf32>
      %c0_9 = arith.constant 0 : index
      %c0_10 = arith.constant 0 : index
      %11 = vector.load %arg5[%c0_9, %c0_10] : memref<8x16xf32, #tpu.memory_space<vmem>>, vector<8x16xf32>
      tpu.vector_store %arg5[%c0_9, %c0_10], %10 {strides = array<i32>} : memref<8x16xf32, #tpu.memory_space<vmem>>, vector<8x16xf32>,
    } else {
    }
    %c0 = arith.constant 0 : index
    %c0_1 = arith.constant 0 : index
    %3 = vector.load %arg3[%c0, %c0_1] : memref<8x32xf32, #tpu.memory_space<vmem>>, vector<8x32xf32>
    %c0_2 = arith.constant 0 : index
    %c0_3 = arith.constant 0 : index
    %4 = vector.load %arg4[%c0_2, %c0_3] : memref<32x16xf32, #tpu.memory_space<vmem>>, vector<32x16xf32>
    %5 = math.absf %4 : vector<32x16xf32>
    %c0_4 = arith.constant 0 : index
    %c0_5 = arith.constant 0 : index
    %6 = vector.load %arg5[%c0_4, %c0_5] : memref<8x16xf32, #tpu.memory_space<vmem>>, vector<8x16xf32>
    %cst = arith.constant dense<0.000000e+00> : vector<8x16xf32>
    %7 = tpu.matmul %3, %5, %cst {dimension_numbers = #tpu.dot_dimension_numbers<[1], [0], [0], [1], [0, 0, 1, 1], [], []>} : vector<8x32xf32>, vector<32x16xf32>, vector<8x16xf32> -> vector<8x16xf32>
    %8 = arith.addf %6, %7 : vector<8x16xf32>
    %c0_6 = arith.constant 0 : index
    %c0_7 = arith.constant 0 : index
    %9 = vector.load %arg5[%c0_6, %c0_7] : memref<8x16xf32, #tpu.memory_space<vmem>>, vector<8x16xf32>
    tpu.vector_store %arg5[%c0_6, %c0_7], %8 {strides = array<i32>} : memref<8x16xf32, #tpu.memory_space<vmem>>, vector<8x16xf32>,
    return
  }
  func.func @transform_0(%arg0: i32, %arg1: i32, %arg2: i32) -> (i32, i32) {
    %c0_i32 = arith.constant 0 : i32
    return %arg0, %arg2 : i32, i32
  }
  func.func @transform_1(%arg0: i32, %arg1: i32, %arg2: i32) -> (i32, i32) {
    %c0_i32 = arith.constant 0 : i32
    return %arg2, %arg1 : i32, i32
  }
  func.func @transform_2(%arg0: i32, %arg1: i32, %arg2: i32) -> (i32, i32) {
    %c0_i32 = arith.constant 0 : i32
    return %arg0, %arg1 : i32, i32
  }
}

</mosaic_0001>

<bundles_post_ra>
// kernel: tpu_custom_call.1
= control target key start
LH: loop header
LB: loop body
LE: loop exit
PB: predicated region body
PF: predicated region fallthrough
CT: control target
= control target key end

     0   :  { %v161_v3 = vmov 0.0   ;;  %vm162_vm0 = vmmov 0   ;;  %vm16_vm1 = vcmask 130048   ;;  %s199_s0 = inlined_call_operand.vmem [shape: f32[8,32], index: 0, kind: input, shape index: {}]   ;;  %s200_s1 = inlined_call_operand.vmem [shape: f32[32,16], index: 1, kind: input, shape index: {}]   ;;  %s201_s2 = inlined_call_operand.hbm [shape: f32[8,16], index: 2, kind: output, shape index: {}]  }
   0x1   :  { %v22_v0 = vld [vmem:[%s200_s1 + $0x18] sm:$0xff]  ;;  %v21_v1 = vld [vmem:[%s200_s1 + $0x10] sm:$0xff]  ;;  %v20_v2 = vld [vmem:[%s200_s1 + $0x8] sm:$0xff]  ;;  %125 = vmatprep.subr.mxu0 %v161_v3  ;;  %133 = vmatprep.mubr.msk.f32.mxu0 %vm162_vm0, %v161_v3 }
   0x2   :  { %v26_v4 = vand.u32 2147483647, %v22_v0  ;;  %v25_v5 = vand.u32 2147483647, %v21_v1  ;;  %v19_v6 = vld [vmem:[%s200_s1] sm:$0xff] }
   0x3   :  { %7 = vsyncpa [#allocation3], 0  ;;  %v24_v7 = vand.u32 2147483647, %v20_v2  ;;  %17 = vst.msk [vmem:[#allocation2] sm:$0xff] %vm16_vm1, %v161_v3  ;;  %v18_v9 = vld [vmem:[%s199_s0] sm:$0xff] }
   0x4   :  { %126 = vmatpush3.msra.mxu0 %v26_v4  ;;  %v23_v8 = vand.u32 2147483647, %v19_v6  ;;  %vm28_vm2 = vcmask 261120   ;;  %s163_s1 = smov [#allocation2]  }
   0x5   :  { %127 = vmatprep.subr.mxu0 %v161_v3  ;;  %s111_s19 = sshll.u32 %s163_s1, 4  ;;  %s112_s19 = int_to_ptr.vmem [resolvable:$true] %s111_s19 }
   0x6   :  { %128 = vmatpush3.msra.mxu0 %v25_v5  ;;  %s139_s20 = scalar_lea.vmem %s112_s19, 128  ;;  %p144_p1 = scmp.lt.s32.totalorder %s112_s19, %s112_s19 }
   0x7   :  { %129 = vmatprep.subr.mxu0 %v161_v3  ;;  %p140_p0 = scmp.ne.s32.totalorder %s112_s19, %s139_s20  ;;  %p145_p2 = scmp.lt.s32.totalorder %s139_s20, %s139_s20 }
   0x8   :  { %130 = vmatpush3.msra.mxu0 %v24_v7 }
   0x9   :  { %131 = vmatprep.subr.mxu0 %v161_v3  ;;  %p146_p3 = por %p145_p2, %p144_p1 }
   0xa   :  { %132 = vmatpush3.msra.mxu0 %v23_v8  ;;  %v27_v10 = vld [vmem:[#allocation2] sm:$0xff] }
   0xb   :  { %134 = vmatmul.mubr.msk.f32.vlgmr.msra.gmra.mxu0 %vm28_vm2, %v18_v9  ;;  %p147_p4 = pnand %p146_p3, %p140_p0 }
  0xcb   :  { %v98_v11 = vpop.f32.mrf.mxu0 }
  0xcc   :  { %v102_v12 = vadd.f32 %v98_v11, %v27_v10 }
  0xcd   :  { %v135_v13 = vpop.f32.mrf.mxu0 }
  0xce   :  { %104 = vst.msk [vmem:[#allocation2] sm:$0xff] %vm16_vm1, %v102_v12 }
  0xcf   :  { %150 = shalt.err (!%p147_p4)
}
  0xd0   :  { %114 = dma.vmem_to_hbm [thread:$0]  %s112_s19, 128, %s201_s2, [#allocation3]  }
  0xd1   :  { %159 = dma.done.wait [#allocation3], 128  }
  0xd2   :  { %160 = vsyncadd [#allocation3], 4294967168 }
  0xd3   :  { %118 = vsyncpa [#allocation3], 1 }

</bundles_post_ra>
